<compile_context>
chip_gen: v7x
topology: tpu7x:2x2x1
jax: 0.10.0
libtpu: 0.0.40
codegen_flags: <defaults>
</compile_context>

<pallas_src>
import functools

import jax
import jax.numpy as jnp
from jax.experimental import pallas as pl
from jax.experimental.pallas import tpu as pltpu


def _resident_kernel(idx_ref,            # SMEM (B_pad,) int32 (scalar prefetch)
                     emb_ref,            # VMEM (N, D) f32 -- whole table, resident
                     w_ref,              # VMEM (1, D) f32
                     lcb_ref,            # VMEM (1, tb) f32  (LoRA scalar + bias, gathered)
                     out_ref,            # VMEM out block (1, tb) f32
                     row_buf,            # scratch VMEM (tb, D) f32
                     *, tb):
    """Fast path: embedding table resident in VMEM, in-kernel dynamic-slice gather."""
    base = pl.program_id(0) * tb

    @pl.loop(0, tb)
    def _gather(j):
        row = idx_ref[base + j]
        row_buf[pl.ds(j, 1), :] = emb_ref[pl.ds(row, 1), :]

    logits = jnp.sum(row_buf[...] * w_ref[...], axis=-1)            # (tb,)
    out_ref[...] = jax.nn.sigmoid(logits.reshape(1, tb) + lcb_ref[...])


def _hbm_kernel(idx_ref,                 # SMEM (B_pad,) int32 (scalar prefetch)
                emb_hbm,                 # HBM (ANY) (N, D) f32
                w_ref,                   # VMEM (1, D) f32
                lcb_ref,                 # VMEM (1, tb) f32
                out_ref,                 # VMEM out block (1, tb) f32
                row_buf,                 # scratch VMEM (2, tb, D) f32  (double buffer)
                sem,                     # DMA semaphores (2,) -- one per slot
                *, tb):
    """Large-table path: per-row DMA gather from HBM, double-buffered across tiles."""
    t = pl.program_id(0)
    nt = pl.num_programs(0)

    def issue(tile, slot):
        base = tile * tb

        @pl.loop(0, tb)
        def _issue(j):
            row = idx_ref[base + j]
            pltpu.make_async_copy(emb_hbm.at[pl.ds(row, 1), :],
                                  row_buf.at[slot, pl.ds(j, 1), :],
                                  sem.at[slot]).start()

    # Prime the pipeline on the first grid step (grid is "arbitrary" => sequential).
    @pl.when(t == 0)
    def _():
        issue(0, 0)

    # Prefetch the next tile's rows while this tile's compute runs.
    @pl.when(t + 1 < nt)
    def _():
        issue(t + 1, (t + 1) % 2)

    slot = t % 2
    # Single wait for the whole slot: all tb row DMAs signal the same semaphore
    # and byte counts add up, so one buffer-sized wait covers them all (the wait
    # only depends on the destination byte count; src here is a dummy).
    pltpu.make_async_copy(row_buf.at[slot], row_buf.at[slot], sem.at[slot]).wait()

    rows = row_buf[slot]                                            # (tb, D)
    logits = jnp.sum(rows * w_ref[...], axis=-1)                    # (tb,)
    out_ref[...] = jax.nn.sigmoid(logits.reshape(1, tb) + lcb_ref[...])


def _vmem_capacity_bytes():
    try:
        return int(pltpu.get_tpu_info().vmem_capacity_bytes)
    except Exception:
        return 64 << 20   # conservative (v7x physical VMEM per TC)


def _pick_tile(B, batch_tile):
    if batch_tile is not None:
        tb = int(batch_tile)
        b_pad = pl.cdiv(max(B, 1), tb) * tb
        return tb, b_pad
    # Lane-dense padding; prefer >= 2 grid steps so v7x can use both TensorCores.
    b_pad = pl.cdiv(max(B, 1), 128) * 128
    tb = 512
    while tb > 128 and (b_pad % tb != 0 or b_pad // tb < 2):
        tb //= 2
    return tb, b_pad


def mlp_lora_forward(item_indices, emb_weight, lora_A, lora_B, aff_w, aff_b,
                     *, lora_alpha, lora_r, batch_tile=None, table_in_vmem=None):
    """item_indices: (B,) int; returns rating (B, 1) f32."""
    B = int(item_indices.shape[0])
    N, D = emb_weight.shape
    scaling = float(lora_alpha) / float(lora_r)

    tb, b_pad = _pick_tile(B, batch_tile)
    num_tiles = b_pad // tb

    # Clamp (PyTorch nn.Embedding would raise on OOB; clamping keeps the gathers
    # in bounds) and pad the index vector to a tile multiple.
    idx = jnp.clip(item_indices.astype(jnp.int32), 0, N - 1)
    idx = jnp.pad(idx, (0, b_pad - B))

    emb = emb_weight.astype(jnp.float32)
    w_row = aff_w.reshape(1, D).astype(jnp.float32)                          # (1, D)

    # Fold the whole LoRA branch + bias into one per-item scalar (exact algebra):
    #   lcb[i] = scaling * (lora_A[i] @ (lora_B @ w^T)) + b
    bw = lora_B.astype(jnp.float32) @ aff_w.reshape(D, 1).astype(jnp.float32)  # (r, 1)
    lc = (scaling * (lora_A.astype(jnp.float32) @ bw)).reshape(N)              # (N,)
    lcb = (lc[idx] + aff_b.reshape(()).astype(jnp.float32)).reshape(1, b_pad)  # (1, B_pad)

    vmem_cap = _vmem_capacity_bytes()
    table_bytes = N * D * 4
    if table_in_vmem is None:
        # 2x table: pipelined inputs are double-buffered even for a constant block.
        table_in_vmem = (2 * table_bytes + tb * D * 4 + (4 << 20)) <= int(0.7 * vmem_cap)

    out_shape = jax.ShapeDtypeStruct((1, b_pad), jnp.float32)
    out_spec = pl.BlockSpec((1, tb), lambda t, idx_r: (0, t))
    w_spec = pl.BlockSpec((1, D), lambda t, idx_r: (0, 0))
    lcb_spec = pl.BlockSpec((1, tb), lambda t, idx_r: (0, t))

    if table_in_vmem:
        need = 2 * table_bytes + tb * D * 4 + 8 * tb * 4 + (1 << 20)
        vmem_limit = int(min(0.9 * vmem_cap, max(need, 16 << 20)))
        out = pl.pallas_call(
            functools.partial(_resident_kernel, tb=tb),
            out_shape=out_shape,
            grid_spec=pltpu.PrefetchScalarGridSpec(
                num_scalar_prefetch=1,
                grid=(num_tiles,),
                in_specs=[
                    pl.BlockSpec((N, D), lambda t, idx_r: (0, 0)),   # table resident in VMEM
                    w_spec,
                    lcb_spec,
                ],
                out_specs=out_spec,
                scratch_shapes=[pltpu.VMEM((tb, D), jnp.float32)]),
            compiler_params=pltpu.CompilerParams(
                dimension_semantics=("parallel",),
                vmem_limit_bytes=vmem_limit),
        )(idx, emb, w_row, lcb)
    else:
        need = 2 * tb * D * 4 + 8 * tb * 4 + (1 << 20)
        vmem_limit = int(min(0.9 * vmem_cap, max(need, 16 << 20)))
        out = pl.pallas_call(
            functools.partial(_hbm_kernel, tb=tb),
            out_shape=out_shape,
            grid_spec=pltpu.PrefetchScalarGridSpec(
                num_scalar_prefetch=1,
                grid=(num_tiles,),
                in_specs=[
                    pl.BlockSpec(memory_space=pl.ANY),               # table stays in HBM
                    w_spec,
                    lcb_spec,
                ],
                out_specs=out_spec,
                scratch_shapes=[
                    pltpu.VMEM((2, tb, D), jnp.float32),             # double buffer
                    pltpu.SemaphoreType.DMA((2,)),                   # one sem per slot
                ]),
            # "arbitrary": the cross-tile prefetch (prime at t==0, fetch t+1 at
            # step t) relies on sequential grid execution on one core.
            compiler_params=pltpu.CompilerParams(
                dimension_semantics=("arbitrary",),
                vmem_limit_bytes=vmem_limit),
        )(idx, emb, w_row, lcb)

    return out[0, :B].reshape(B, 1)


if __name__ == "__main__":
    # config for MLPLoRA
    config = dict(num_items=32, latent_dim=32, lora_r=4, lora_alpha=8)
    N, D, r = config["num_items"], config["latent_dim"], config["lora_r"]
    scaling = config["lora_alpha"] / config["lora_r"]

    key = jax.random.PRNGKey(0)
    k_idx, k_idx2, k_emb, k_la, k_lb, k_w, k_b = jax.random.split(key, 7)

    emb_weight = jax.random.normal(k_emb, (N, D), dtype=jnp.float32)
    # NOTE: the PyTorch init zeroes lora_A; use non-zero values so the LoRA path
    # actually exercises compute.
    lora_A = 0.1 * jax.random.normal(k_la, (N, r), dtype=jnp.float32)
    lora_B = jax.random.normal(k_lb, (r, D), dtype=jnp.float32)
    aff_w = (1.0 / jnp.sqrt(D)) * jax.random.normal(k_w, (1, D), dtype=jnp.float32)
    aff_b = jax.random.normal(k_b, (1,), dtype=jnp.float32)

    def reference(indices):
        rows = emb_weight[indices] + (lora_A[indices] @ lora_B) * scaling
        return jax.nn.sigmoid(rows @ aff_w.T + aff_b)

    # --- Path 1: resident-table fast path (table fits VMEM; demo table is 4 KB)
    B1 = 8
    idx1 = jax.random.randint(k_idx, (B1,), 0, N, dtype=jnp.int32)
    out1 = mlp_lora_forward(idx1, emb_weight, lora_A, lora_B, aff_w, aff_b,
                            lora_alpha=config["lora_alpha"], lora_r=config["lora_r"])
    out1 = jax.block_until_ready(out1)
    assert out1.shape == (B1, 1)
    assert jnp.allclose(out1, reference(idx1), atol=1e-5, rtol=1e-5)

    # --- Path 2: HBM-resident table with double-buffered per-row DMA gather
    #     (forced here so the large-table path is exercised across several tiles).
    B2 = 300
    idx2 = jax.random.randint(k_idx2, (B2,), 0, N, dtype=jnp.int32)
    out2 = mlp_lora_forward(idx2, emb_weight, lora_A, lora_B, aff_w, aff_b,
                            lora_alpha=config["lora_alpha"], lora_r=config["lora_r"],
                            table_in_vmem=False)
    out2 = jax.block_until_ready(out2)
    assert out2.shape == (B2, 1)
    assert jnp.allclose(out2, reference(idx2), atol=1e-5, rtol=1e-5)

    print("KERNEL_OK")
</pallas_src>

<mosaic_0001>
module attributes {stable_mosaic.version = 11 : i64} {
  func.func @_resident_kernel(%arg0: i32, %arg1: memref<128xi32, #tpu.memory_space<smem>>, %arg2: memref<32x32xf32, #tpu.memory_space<vmem>>, %arg3: memref<1x32xf32, #tpu.memory_space<vmem>>, %arg4: memref<1x128xf32, #tpu.memory_space<vmem>>, %arg5: memref<1x128xf32, #tpu.memory_space<vmem>>, %arg6: memref<128x32xf32, #tpu.memory_space<vmem>>) attributes {dimension_semantics = [#tpu.dimension_semantics<parallel>], iteration_bounds = array<i64: 1>, scalar_prefetch = 1 : i64, scratch_operands = 1 : i64, tpu.core_type = #tpu.core_type<tc>, window_params = [{pipeline_mode = #tpu.pipeline_mode<synchronous>, transform_indices = @transform_0, window_bounds = array<i64: 32, 32>}, {pipeline_mode = #tpu.pipeline_mode<synchronous>, transform_indices = @transform_1, window_bounds = array<i64: 1, 32>}, {transform_indices = @transform_2, window_bounds = array<i64: 1, 128>}, {transform_indices = @transform_3, window_bounds = array<i64: 1, 128>}]} {
    %c128_i32 = arith.constant 128 : i32
    %0 = arith.muli %arg0, %c128_i32 : i32
    %c0_i32 = arith.constant 0 : i32
    %c128_i32_0 = arith.constant 128 : i32
    %1 = arith.addi %c0_i32, %c128_i32_0 : i32
    %c1_i32 = arith.constant 1 : i32
    scf.for %arg7 = %c0_i32 to %1 step %c1_i32  : i32 {
      %c1_i32_10 = arith.constant 1 : i32
      %16 = arith.muli %arg7, %c1_i32_10 : i32
      %c0_i32_11 = arith.constant 0 : i32
      %17 = arith.addi %c0_i32_11, %16 : i32
      %18 = arith.addi %0, %17 : i32
      %19 = arith.index_cast %18 : i32 to index
      %20 = memref.load %arg1[%19] : memref<128xi32, #tpu.memory_space<smem>>
      %21 = arith.index_cast %20 : i32 to index
      %c0_12 = arith.constant 0 : index
      %22 = vector.load %arg2[%21, %c0_12] : memref<32x32xf32, #tpu.memory_space<vmem>>, vector<1x32xf32>
      %23 = arith.index_cast %17 : i32 to index
      %c0_13 = arith.constant 0 : index
      %24 = vector.load %arg6[%23, %c0_13] : memref<128x32xf32, #tpu.memory_space<vmem>>, vector<1x32xf32>
      tpu.vector_store %arg6[%23, %c0_13], %22 {strides = array<i32>} : memref<128x32xf32, #tpu.memory_space<vmem>>, vector<1x32xf32>,
    }
    %c128_i32_1 = arith.constant 128 : i32
    %c0 = arith.constant 0 : index
    %c0_2 = arith.constant 0 : index
    %2 = vector.load %arg6[%c0, %c0_2] : memref<128x32xf32, #tpu.memory_space<vmem>>, vector<128x32xf32>
    %c0_3 = arith.constant 0 : index
    %c0_4 = arith.constant 0 : index
    %3 = vector.load %arg3[%c0_3, %c0_4] : memref<1x32xf32, #tpu.memory_space<vmem>>, vector<1x32xf32>
    %4 = vector.broadcast %3 : vector<1x32xf32> to vector<128x32xf32>
    %5 = arith.mulf %2, %4 : vector<128x32xf32>
    %cst = arith.constant dense<0.000000e+00> : vector<128xf32>
    %6 = vector.multi_reduction <add>, %5, %cst [1] : vector<128x32xf32> to vector<128xf32>
    %7 = vector.shape_cast %6 : vector<128xf32> to vector<1x128xf32>
    %c0_5 = arith.constant 0 : index
    %c0_6 = arith.constant 0 : index
    %8 = vector.load %arg4[%c0_5, %c0_6] : memref<1x128xf32, #tpu.memory_space<vmem>>, vector<1x128xf32>
    %9 = arith.addf %7, %8 : vector<1x128xf32>
    %10 = arith.negf %9 : vector<1x128xf32>
    %11 = math.exp %10 : vector<1x128xf32>
    %cst_7 = arith.constant 1.000000e+00 : f32
    %12 = vector.broadcast %cst_7 : f32 to vector<1x128xf32>
    %13 = arith.addf %12, %11 : vector<1x128xf32>
    %14 = arith.divf %12, %13 : vector<1x128xf32>
    %c0_8 = arith.constant 0 : index
    %c0_9 = arith.constant 0 : index
    %15 = vector.load %arg5[%c0_8, %c0_9] : memref<1x128xf32, #tpu.memory_space<vmem>>, vector<1x128xf32>
    tpu.vector_store %arg5[%c0_8, %c0_9], %14 {strides = array<i32>} : memref<1x128xf32, #tpu.memory_space<vmem>>, vector<1x128xf32>,
    return
  }
  func.func @transform_0(%arg0: i32, %arg1: memref<128xi32, #tpu.memory_space<smem>>) -> (i32, i32) {
    %c0_i32 = arith.constant 0 : i32
    %c0_i32_0 = arith.constant 0 : i32
    %c0_i32_1 = arith.constant 0 : i32
    return %c0_i32, %c0_i32_0 : i32, i32
  }
  func.func @transform_1(%arg0: i32, %arg1: memref<128xi32, #tpu.memory_space<smem>>) -> (i32, i32) {
    %c0_i32 = arith.constant 0 : i32
    %c0_i32_0 = arith.constant 0 : i32
    %c0_i32_1 = arith.constant 0 : i32
    return %c0_i32, %c0_i32_0 : i32, i32
  }
  func.func @transform_2(%arg0: i32, %arg1: memref<128xi32, #tpu.memory_space<smem>>) -> (i32, i32) {
    %c0_i32 = arith.constant 0 : i32
    %c0_i32_0 = arith.constant 0 : i32
    return %c0_i32, %arg0 : i32, i32
  }
  func.func @transform_3(%arg0: i32, %arg1: memref<128xi32, #tpu.memory_space<smem>>) -> (i32, i32) {
    %c0_i32 = arith.constant 0 : i32
    %c0_i32_0 = arith.constant 0 : i32
    return %c0_i32, %arg0 : i32, i32
  }
}

</mosaic_0001>

<bundles_post_ra>
// kernel: tpu_custom_call.1
= control target key start
LH: loop header
LB: loop body
LE: loop exit
PB: predicated region body
PF: predicated region fallthrough
CT: control target
= control target key end

     0   :  { %s835_s0 = inlined_call_operand.hbm [shape: s32[128], index: 0, kind: input, shape index: {}]   ;;  %s836_s1 = inlined_call_operand.hbm [shape: f32[32,32], index: 1, kind: input, shape index: {}]   ;;  %s837_s2 = inlined_call_operand.vmem [shape: f32[1,32], index: 2, kind: input, shape index: {}]   ;;  %s838_s3 = inlined_call_operand.vmem [shape: f32[1,128], index: 3, kind: input, shape index: {}]   ;;  %s839_s4 = inlined_call_operand.hbm [shape: f32[1,128], index: 4, kind: output, shape index: {}]  }
   0x1   :  { %s630_s17 = scalar_lea.hbm %s835_s0, 16 }
   0x2   :  { %p631_p0 = scmp.ne.s32.totalorder %s835_s0, %s630_s17  ;;  %p634_p1 = scmp.lt.u32.totalorder %s630_s17, %s835_s0 }
   0x4   :  { %p636_p2 = pnand %p634_p1, %p631_p0 }
   0x6   :  { %639 = shalt.err (!%p636_p2)  }
   0x7   :  { %s698_s22 = smov [#allocation4]  }
   0x8   :  { %10 = dma.hbm_to_smem %s835_s0, 16, %s698_s22, [#allocation3] }
   0x9   :  { %688 = dma.done.wait [#allocation3], 16 }
   0xa   :  { %689 = vsyncadd [#allocation3], 4294967280 }
   0xb   :  { %12 = sfence }
   0xc   :  { %13 = vsyncpa [#allocation6], 0 }
   0xd   :  { %14 = vsyncpa [#allocation7], 0  ;;  %s699_s25 = smov [#allocation5]   ;;  %s640_s29 = scalar_lea.hbm %s836_s1, 512 }
   0xe   :  { %s20_s26 = sshll.u32 %s699_s25, 4  ;;  %p641_p3 = scmp.ne.s32.totalorder %s836_s1, %s640_s29  ;;  %s21_s26 = int_to_ptr.vmem [resolvable:$true] %s20_s26 }
   0xf   :  { %p644_p4 = scmp.lt.u32.totalorder %s640_s29, %s836_s1 }
  0x11   :  { %p646_p5 = pnand %p644_p4, %p641_p3 }
  0x13   :  { %649 = shalt.err (!%p646_p5)
}
  0x14   :  { %s650_s0 = scalar_lea.vmem %s21_s26, 512  ;;  %p655_p7 = scmp.lt.s32.totalorder %s21_s26, %s21_s26 }
  0x15   :  { %p651_p6 = scmp.ne.s32.totalorder %s21_s26, %s650_s0  ;;  %p656_p8 = scmp.lt.s32.totalorder %s650_s0, %s650_s0 }
  0x17   :  { %p657_p9 = por %p656_p8, %p655_p7 }
  0x19   :  { %p658_p10 = pnand %p657_p9, %p651_p6 }
  0x1b   :  { %661 = shalt.err (!%p658_p10)
}
  0x1c   :  { %s700_s8 = smov 128   ;;  %s701_s9 = smov 8  }
  0x1d   :  { %26 = dma.hbm_to_vmem [thread:$0]  %s836_s1, 512, %s21_s26, [#allocation6], %s700_s8, %s700_s8, %s701_s9  }
  0x1e   :  { %690 = dma.done.wait [#allocation6], 512  }
  0x1f   :  { %691 = vsyncadd [#allocation6], 4294966784  ;;  %s694_s12 = smov 0  }
  0x20 LB: > { %s42_s13 = sld [smem:[#allocation4 + %s696_s12]]  ;;  %vm46_vm0 = vcmask 253952   ;;  %s45_s15 = scalar_lea.vmem [#allocation2], %s696_s12  ;;  %s696_s12 = sphi %s694_s12, %s40_s12  }
  0x21   : > { %s40_s12 = sadd.s32 1, %s696_s12  }
  0x22   : > { %p37_p11 = scmp.ge.s32.totalorder %s40_s12, 128  }
  0x23   :  { %v532_v2 = vld [vmem:[%s837_s2] ss:$0 sm:$0xff] (%p37_p11)  ;;  %vm87_vm1 = vcmask (%p37_p11), 261120   ;;  %v702_v51 = vmov (%p37_p11), 0   ;;  %vm408_vm2 = vcmask (%p37_p11), 130112   ;;  %vm415_vm3 = vcmask (%p37_p11), 195712  }
  0x24   :  { %39 = sbr.rel (!%p37_p11) target bundleno = 32 (0x20), region = 45  ;;  %v533_v50 = vld [vmem:[%s838_s3] ss:$0 sm:$0xff] (%p37_p11)  ;;  %565 = vset.pattern.permute.xlu1 (%p37_p11), %v702_v51  ;;  %564 = vset.pattern.permute.xlu0 (%p37_p11), %v702_v51  ;;  %vm422_vm4 = vcmask (%p37_p11), 261312   ;;  %vm429_vm5 = vcmask (%p37_p11), 326912   ;;  %vm436_vm6 = vcmask (%p37_p11), 392512  }
  0x25   :  { %vm443_vm7 = vcmask (%p37_p11), 458112   ;;  %vm450_vm8 = vcmask (%p37_p11), 523712   ;;  %vm457_vm9 = vcmask (%p37_p11), 589312   ;;  %vm464_vm10 = vcmask (%p37_p11), 654912   ;;  %s703_s3 = smov (%p37_p11), [#allocation8]  }
  0x26   : > { %s43_s14 = scalar_lea.vmem [#allocation5], %s42_s13  ;;  %vm471_vm11 = vcmask (%p37_p11), 720512   ;;  %vm478_vm12 = vcmask (%p37_p11), 786112   ;;  %vm485_vm13 = vcmask (%p37_p11), 851712   ;;  %vm492_vm14 = vcmask (%p37_p11), 917312   ;;  %s516_s18 = sshll.u32 (%p37_p11), %s703_s3, 4  ;;  %s517_s18 = int_to_ptr.vmem [resolvable:$true] %s516_s18 }
  0x27   : > { %v44_v0 = vld [vmem:[%s43_s14] sm:$0x1]  ;;  %vm499_vm15 = vcmask (%p37_p11), 982912   ;;  %s662_s19 = scalar_lea.vmem (%p37_p11), %s517_s18, 16  ;;  %s666_s20 = scalar_lea.vmem (%p37_p11), %s517_s18, 32 }
  0x28   : > { %47 = vst.msk [vmem:[%s45_s15] sm:$0x1] %vm46_vm0, %v44_v0  ;;  %vm506_vm0 = vcmask (%p37_p11), 1048512   ;;  %p663_p12 = scmp.ne.s32.totalorder (%p37_p11), %s517_s18, %s662_s19  ;;  %p667_p13 = scmp.lt.s32.totalorder (%p37_p11), %s517_s18, %s517_s18 }
  0x29   :  { %p668_p0 = scmp.lt.s32.totalorder (%p37_p11), %s666_s20, %s662_s19 }
  0x2b   :  { %p669_p1 = por %p668_p0, %p667_p13 }
  0x2d   :  { %p670_p2 = pnand %p669_p1, %p663_p12 }
  0x2f   :  { %v50_v1 = vld [vmem:[#allocation2 + $0x10] sm:$0xff]  ;;  %v48_v3 = vld [vmem:[#allocation2] sm:$0xff]  ;;  %v51_v6 = vld [vmem:[#allocation2 + $0x18] sm:$0xff] }
  0x30   :  { %v73_v4 = vmul.f32 %v532_v2, %v50_v1  ;;  %v71_v5 = vmul.f32 %v532_v2, %v48_v3  ;;  %v49_v7 = vld [vmem:[#allocation2 + $0x8] sm:$0xff]  ;;  %v74_v8 = vmul.f32 %v532_v2, %v51_v6  ;;  %v52_v11 = vld [vmem:[#allocation2 + $0x20] sm:$0xff]  ;;  %v55_v18 = vld [vmem:[#allocation2 + $0x38] sm:$0xff] }
  0x31   :  { %v72_v9 = vmul.f32 %v532_v2, %v49_v7  ;;  %v53_v10 = vld [vmem:[#allocation2 + $0x28] sm:$0xff]  ;;  %v75_v17 = vmul.f32 %v532_v2, %v52_v11  ;;  %v54_v19 = vld [vmem:[#allocation2 + $0x30] sm:$0xff]  ;;  %v78_v22 = vmul.f32 %v532_v2, %v55_v18  ;;  %v56_v25 = vld [vmem:[#allocation2 + $0x40] sm:$0xff] }
  0x32   :  { %v94_v12 = vsel %vm87_vm1, %v73_v4, 0.0  ;;  %v88_v13 = vsel %vm87_vm1, %v71_v5, 0.0  ;;  %v97_v14 = vsel %vm87_vm1, %v74_v8, 0.0  ;;  %v76_v16 = vmul.f32 %v532_v2, %v53_v10  ;;  %v57_v24 = vld [vmem:[#allocation2 + $0x48] sm:$0xff]  ;;  %v59_v30 = vld [vmem:[#allocation2 + $0x58] sm:$0xff]  ;;  %v58_v31 = vld [vmem:[#allocation2 + $0x50] sm:$0xff] }
  0x33   :  { %95 = vadd.xlane.f32.xlu1 %v94_v12  ;;  %89 = vadd.xlane.f32.xlu0 %v88_v13  ;;  %v91_v15 = vsel %vm87_vm1, %v72_v9, 0.0  ;;  %v100_v21 = vsel %vm87_vm1, %v75_v17, 0.0  ;;  %v77_v23 = vmul.f32 %v532_v2, %v54_v19  ;;  %v109_v26 = vsel %vm87_vm1, %v78_v22, 0.0  ;;  %v61_v36 = vld [vmem:[#allocation2 + $0x68] sm:$0xff]  ;;  %v60_v37 = vld [vmem:[#allocation2 + $0x60] sm:$0xff]  ;;  %v63_v42 = vld [vmem:[#allocation2 + $0x78] sm:$0xff] }
  0x34   :  { %v103_v20 = vsel %vm87_vm1, %v76_v16, 0.0  ;;  %v80_v28 = vmul.f32 %v532_v2, %v57_v24  ;;  %v79_v29 = vmul.f32 %v532_v2, %v56_v25  ;;  %v82_v34 = vmul.f32 %v532_v2, %v59_v30  ;;  %v62_v43 = vld [vmem:[#allocation2 + $0x70] sm:$0xff] }
  0x35   :  { %v106_v27 = vsel %vm87_vm1, %v77_v23, 0.0  ;;  %v81_v35 = vmul.f32 %v532_v2, %v58_v31  ;;  %v84_v40 = vmul.f32 %v532_v2, %v61_v36  ;;  %v83_v41 = vmul.f32 %v532_v2, %v60_v37 }
  0x36   :  { %v115_v32 = vsel %vm87_vm1, %v80_v28, 0.0  ;;  %v112_v33 = vsel %vm87_vm1, %v79_v29, 0.0  ;;  %v121_v38 = vsel %vm87_vm1, %v82_v34, 0.0  ;;  %v86_v46 = vmul.f32 %v532_v2, %v63_v42 }
  0x37   :  { %98 = vadd.xlane.f32.xlu1 %v97_v14  ;;  %92 = vadd.xlane.f32.xlu0 %v91_v15  ;;  %v118_v39 = vsel %vm87_vm1, %v81_v35, 0.0  ;;  %v127_v44 = vsel %vm87_vm1, %v84_v40, 0.0  ;;  %v124_v45 = vsel %vm87_vm1, %v83_v41, 0.0  ;;  %v85_v47 = vmul.f32 %v532_v2, %v62_v43 }
  0x38   :  { %v133_v48 = vsel %vm87_vm1, %v86_v46, 0.0 }
  0x39   :  { %v130_v49 = vsel %vm87_vm1, %v85_v47, 0.0 }
  0x3b   :  { %104 = vadd.xlane.f32.xlu1 %v103_v20  ;;  %101 = vadd.xlane.f32.xlu0 %v100_v21 }
  0x3f   :  { %110 = vadd.xlane.f32.xlu1 %v109_v26  ;;  %107 = vadd.xlane.f32.xlu0 %v106_v27 }
  0x43   :  { %116 = vadd.xlane.f32.xlu1 %v115_v32  ;;  %113 = vadd.xlane.f32.xlu0 %v112_v33 }
  0x47   :  { %122 = vadd.xlane.f32.xlu1 %v121_v38  ;;  %119 = vadd.xlane.f32.xlu0 %v118_v39 }
  0x4b   :  { %128 = vadd.xlane.f32.xlu1 %v127_v44  ;;  %125 = vadd.xlane.f32.xlu0 %v124_v45 }
  0x4f   :  { %134 = vadd.xlane.f32.xlu1 %v133_v48  ;;  %131 = vadd.xlane.f32.xlu0 %v130_v49 }
  0x60   :  { %147 = vbcast.lane.b32.xlu1 %v533_v50, 264 }
  0x64   :  { %151 = vbcast.lane.b32.xlu1 %v533_v50, 272 }
  0x65   :  { %143 = vbcast.lane.b32.xlu0 %v533_v50, 256 }
  0x68   :  { %155 = vbcast.lane.b32.xlu1 %v533_v50, 280 }
  0x69   :  { %159 = vbcast.lane.b32.xlu0 %v533_v50, 288 }
  0x6c   :  { %163 = vbcast.lane.b32.xlu1 %v533_v50, 296 }
  0x6d   :  { %167 = vbcast.lane.b32.xlu0 %v533_v50, 304 }
  0x70   :  { %171 = vbcast.lane.b32.xlu1 %v533_v50, 312 }
  0x71   :  { %175 = vbcast.lane.b32.xlu0 %v533_v50, 320 }
  0x74   :  { %179 = vbcast.lane.b32.xlu1 %v533_v50, 328 }
  0x75   :  { %183 = vbcast.lane.b32.xlu0 %v533_v50, 336 }
  0x78   :  { %187 = vbcast.lane.b32.xlu1 %v533_v50, 344 }
  0x79   :  { %191 = vbcast.lane.b32.xlu0 %v533_v50, 352 }
  0x7c   :  { %195 = vbcast.lane.b32.xlu1 %v533_v50, 360 }
  0x7d   :  { %199 = vbcast.lane.b32.xlu0 %v533_v50, 368 }
  0x80   :  { %203 = vbcast.lane.b32.xlu1 %v533_v50, 376 }
  0xc0   :  { %v96_v52 = vpop.xlane.xlu1 %95  ;;  %v90_v53 = vpop.xlane.xlu0 %89 }
  0xc4   :  { %v99_v54 = vpop.xlane.xlu1 %98  ;;  %v93_v55 = vpop.xlane.xlu0 %92 }
  0xc8   :  { %v105_v56 = vpop.xlane.xlu1 %104  ;;  %v102_v57 = vpop.xlane.xlu0 %101 }
  0xcc   :  { %v111_v58 = vpop.xlane.xlu1 %110  ;;  %v108_v59 = vpop.xlane.xlu0 %107 }
  0xd0   :  { %v117_v60 = vpop.xlane.xlu1 %116  ;;  %v114_v61 = vpop.xlane.xlu0 %113 }
  0xd4   :  { %v775_v62 = vpop.xlane.xlu1 %122  ;;  %v120_v63 = vpop.xlane.xlu0 %119 }
  0xd8   :  { %v777_v0 = vpop.xlane.xlu1 %128  ;;  %v126_v1 = vpop.xlane.xlu0 %125 }
  0xdc   :  { %v779_v2 = vpop.xlane.xlu1 %134  ;;  %v781_v3 = vpop.xlane.xlu0 %131 }
  0xe0   :  { %v148_v4 = vpop.permute.xlu1 %147  ;;  %v144_v5 = vpop.permute.xlu0 %143 }
  0xe1   :  { %v222_v6 = vadd.f32 %v148_v4, %v93_v55  ;;  %v221_v7 = vadd.f32 %v144_v5, %v90_v53 }
  0xe3   :  { %v535_v8 = vmul.f32 -1.442695, %v222_v6  ;;  %v534_v9 = vmul.f32 -1.442695, %v221_v7 }
  0xe4   :  { %v152_v10 = vpop.permute.xlu1 %151  ;;  %v160_v11 = vpop.permute.xlu0 %159 }
  0xe5   :  { %566 = vpow2.f32 %v535_v8  ;;  %v223_v12 = vadd.f32 %v152_v10, %v96_v52  ;;  %v225_v13 = vadd.f32 %v160_v11, %v102_v57 }
  0xe6   :  { %568 = vpow2.f32 %v534_v9 }
  0xe7   :  { %v536_v14 = vmul.f32 -1.442695, %v223_v12  ;;  %v538_v15 = vmul.f32 -1.442695, %v225_v13 }
  0xe8   :  { %v156_v16 = vpop.permute.xlu1 %155  ;;  %v168_v17 = vpop.permute.xlu0 %167 }
  0xe9   :  { %570 = vpow2.f32 %v536_v14  ;;  %v224_v18 = vadd.f32 %v156_v16, %v99_v54  ;;  %v227_v19 = vadd.f32 %v168_v17, %v108_v59 }
  0xea   :  { %572 = vpow2.f32 %v538_v15 }
  0xeb   :  { %v537_v20 = vmul.f32 -1.442695, %v224_v18  ;;  %v540_v21 = vmul.f32 -1.442695, %v227_v19 }
  0xec   :  { %v164_v22 = vpop.permute.xlu1 %163  ;;  %v176_v23 = vpop.permute.xlu0 %175 }
  0xed   :  { %574 = vpow2.f32 %v537_v20  ;;  %v226_v24 = vadd.f32 %v164_v22, %v105_v56  ;;  %v229_v25 = vadd.f32 %v176_v23, %v114_v61 }
  0xee   :  { %576 = vpow2.f32 %v540_v21 }
  0xef   :  { %v567_v26 = vpop.eup %566  ;;  %v539_v27 = vmul.f32 -1.442695, %v226_v24  ;;  %v542_v30 = vmul.f32 -1.442695, %v229_v25 }
  0xf0   :  { %v569_v28 = vpop.eup %568  ;;  %v286_v29 = vadd.f32 1.0, %v567_v26  ;;  %v172_v31 = vpop.permute.xlu1 %171 }
  0xf1   :  { %v184_v32 = vpop.permute.xlu0 %183  ;;  %v285_v33 = vadd.f32 1.0, %v569_v28  ;;  %578 = vpow2.f32 %v539_v27  ;;  %v228_v34 = vadd.f32 %v172_v31, %v111_v58 }
  0xf2   :  { %v231_v35 = vadd.f32 %v184_v32, %v120_v63  ;;  %580 = vrcp.f32 %v286_v29 }
  0xf3   :  { %v571_v36 = vpop.eup %570  ;;  %582 = vrcp.f32 %v285_v33  ;;  %v541_v37 = vmul.f32 -1.442695, %v228_v34 }
  0xf4   :  { %v573_v38 = vpop.eup %572  ;;  %v287_v39 = vadd.f32 1.0, %v571_v36  ;;  %584 = vpow2.f32 %v542_v30  ;;  %v544_v40 = vmul.f32 -1.442695, %v231_v35  ;;  %v180_v41 = vpop.permute.xlu1 %179  ;;  %v397_v36 = vlaneseq }
  0xf5   :  { %v192_v42 = vpop.permute.xlu0 %191  ;;  %v289_v43 = vadd.f32 1.0, %v573_v38  ;;  %586 = vpow2.f32 %v541_v37  ;;  %v230_v44 = vadd.f32 %v180_v41, %v117_v60 }
  0xf6   :  { %v233_v45 = vadd.f32 %v192_v42, %v126_v1  ;;  %588 = vrcp.f32 %v287_v39  ;;  %v787_v37 = vand.u32 127, %v397_v36  ;;  %v789_v38 = vshrl.u32 %v397_v36, 7 }
  0xf7   :  { %v575_v46 = vpop.eup %574  ;;  %590 = vrcp.f32 %v289_v43  ;;  %v543_v47 = vmul.f32 -1.442695, %v230_v44 }
  0xf8   :  { %v577_v48 = vpop.eup %576  ;;  %v288_v49 = vadd.f32 1.0, %v575_v46  ;;  %592 = vpow2.f32 %v544_v40  ;;  %v546_v50 = vmul.f32 -1.442695, %v233_v45  ;;  %v188_v51 = vpop.permute.xlu1 %187  ;;  %v403_v39 = vadd.s32 4294967288, %v787_v37 }
  0xf9   :  { %v200_v52 = vpop.permute.xlu0 %199  ;;  %v291_v53 = vadd.f32 1.0, %v577_v48  ;;  %594 = vpow2.f32 %v543_v47  ;;  %v232_v54 = vadd.f32 %v188_v51, %v775_v62  ;;  %v410_v41 = vadd.s32 4294967280, %v787_v37 }
  0xfa   :  { %v235_v55 = vadd.f32 %v200_v52, %v781_v3  ;;  %596 = vrcp.f32 %v288_v49  ;;  %v417_v42 = vadd.s32 4294967272, %v787_v37  ;;  %v406_v43 = vsub.s32 %v403_v39, %v789_v38 }
  0xfb   :  { %v579_v56 = vpop.eup %578  ;;  %598 = vrcp.f32 %v291_v53  ;;  %v545_v57 = vmul.f32 -1.442695, %v232_v54  ;;  %v401_v44 = vsub.s32 %v787_v37, %v789_v38  ;;  %v413_v46 = vsub.s32 %v410_v41, %v789_v38 }
  0xfc   :  { %v548_v58 = vmul.f32 -1.442695, %v235_v55  ;;  %v581_v59 = vpop.eup %580  ;;  %v290_v60 = vadd.f32 1.0, %v579_v56  ;;  %600 = vpow2.f32 %v546_v50  ;;  %v196_v61 = vpop.permute.xlu1 %195  ;;  %v424_v48 = vadd.s32 4294967264, %v787_v37 }
  0xfd   :  { %v583_v63 = vpop.eup %582  ;;  %602 = vpow2.f32 %v545_v57  ;;  %v234_v1 = vadd.f32 %v196_v61, %v777_v0  ;;  %353 = vperm.xlu1 %565, %v581_v59   ;;  %v420_v49 = vsub.s32 %v417_v42, %v789_v38  ;;  %v431_v50 = vadd.s32 4294967256, %v787_v37 }
  0xfe   :  { %v585_v4 = vpop.eup %584  ;;  %604 = vrcp.f32 %v290_v60  ;;  %350 = vperm.xlu0 %564, %v583_v63   ;;  %v427_v54 = vsub.s32 %v424_v48, %v789_v38  ;;  %v438_v57 = vadd.s32 4294967248, %v787_v37  ;;  %v445_v60 = vadd.s32 4294967240, %v787_v37 }
  0xff   :  { %v587_v62 = vpop.eup %586  ;;  %v293_v5 = vadd.f32 1.0, %v585_v4  ;;  %606 = vpow2.f32 %v548_v58  ;;  %v547_v3 = vmul.f32 -1.442695, %v234_v1  ;;  %v434_v59 = vsub.s32 %v431_v50, %v789_v38 }
 0x100   :  { %v589_v6 = vpop.eup %588  ;;  %v292_v7 = vadd.f32 1.0, %v587_v62  ;;  %v204_v8 = vpop.permute.xlu1 %203  ;;  %v452_v63 = vadd.s32 4294967232, %v787_v37  ;;  %v441_v62 = vsub.s32 %v438_v57, %v789_v38  ;;  %v501_v39 = vadd.s32 4294967176, %v787_v37 }
 0x101   :  { %v591_v9 = vpop.eup %590  ;;  %608 = vrcp.f32 %v293_v5  ;;  %v236_v10 = vadd.f32 %v204_v8, %v779_v2  ;;  %356 = vperm.xlu1 %565, %v589_v6   ;;  %v448_v8 = vsub.s32 %v445_v60, %v789_v38 }
 0x102   :  { %v593_v11 = vpop.eup %592  ;;  %610 = vrcp.f32 %v292_v7 }
 0x103   :  { %v595_v12 = vpop.eup %594  ;;  %v295_v0 = vadd.f32 1.0, %v593_v11  ;;  %612 = vpow2.f32 %v547_v3  ;;  %v549_v13 = vmul.f32 -1.442695, %v236_v10  ;;  %v455_v10 = vsub.s32 %v452_v63, %v789_v38 }
 0x104   :  { %v597_v14 = vpop.eup %596  ;;  %v294_v15 = vadd.f32 1.0, %v595_v12 }
 0x105   :  { %v599_v16 = vpop.eup %598  ;;  %614 = vrcp.f32 %v295_v0  ;;  %359 = vperm.xlu0 %564, %v597_v14   ;;  %362 = vperm.xlu1 %565, %v591_v9   ;;  %v459_v9 = vadd.s32 4294967224, %v787_v37  ;;  %v466_v14 = vadd.s32 4294967216, %v787_v37 }
 0x106   :  { %v601_v17 = vpop.eup %600  ;;  %616 = vrcp.f32 %v294_v15 }
 0x107   :  { %v603_v18 = vpop.eup %602  ;;  %v297_v19 = vadd.f32 1.0, %v601_v17  ;;  %618 = vpow2.f32 %v549_v13  ;;  %v462_v17 = vsub.s32 %v459_v9, %v789_v38 }
 0x108   :  { %v605_v20 = vpop.eup %604  ;;  %v296_v2 = vadd.f32 1.0, %v603_v18  ;;  %v473_v18 = vadd.s32 4294967208, %v787_v37 }
 0x109   :  { %v607_v21 = vpop.eup %606  ;;  %620 = vrcp.f32 %v297_v19  ;;  %365 = vperm.xlu0 %564, %v605_v20   ;;  %368 = vperm.xlu1 %565, %v599_v16  }
 0x10a   :  { %622 = vrcp.f32 %v296_v2  ;;  %v299_v22 = vadd.f32 1.0, %v607_v21  ;;  %v469_v2 = vsub.s32 %v466_v14, %v789_v38 }
 0x10b   :  { %v609_v23 = vpop.eup %608 }
 0x10c   :  { %v611_v24 = vpop.eup %610  ;;  %624 = vrcp.f32 %v299_v22 }
 0x10d   :  { %v613_v25 = vpop.eup %612  ;;  %371 = vperm.xlu0 %564, %v611_v24   ;;  %374 = vperm.xlu1 %565, %v609_v23   ;;  %v480_v23 = vadd.s32 4294967200, %v787_v37 }
 0x10e   :  { %v298_v26 = vadd.f32 1.0, %v613_v25 }
 0x10f   :  { %v615_v27 = vpop.eup %614 }
 0x110   :  { %v617_v28 = vpop.eup %616  ;;  %626 = vrcp.f32 %v298_v26  ;;  %v476_v26 = vsub.s32 %v473_v18, %v789_v38 }
 0x111   :  { %v619_v29 = vpop.eup %618  ;;  %377 = vperm.xlu0 %564, %v617_v28   ;;  %380 = vperm.xlu1 %565, %v615_v27   ;;  %v487_v27 = vadd.s32 4294967192, %v787_v37 }
 0x112   :  { %v300_v30 = vadd.f32 1.0, %v619_v29 }
 0x113   :  { %v621_v31 = vpop.eup %620  ;;  %v490_v36 = vsub.s32 %v487_v27, %v789_v38 }
 0x114   :  { %v623_v32 = vpop.eup %622  ;;  %628 = vrcp.f32 %v300_v30  ;;  %v483_v30 = vsub.s32 %v480_v23, %v789_v38 }
 0x115   :  { %383 = vperm.xlu0 %564, %v623_v32   ;;  %386 = vperm.xlu1 %565, %v621_v31  }
 0x116   :  { %v625_v33 = vpop.eup %624 }
 0x119   :  { %392 = vperm.xlu1 %565, %v625_v33   ;;  %v494_v33 = vadd.s32 4294967184, %v787_v37 }
 0x11a   :  { %v627_v34 = vpop.eup %626 }
 0x11b   :  { %389 = vperm.xlu0 %564, %v627_v34   ;;  %v497_v42 = vsub.s32 %v494_v33, %v789_v38 }
 0x11e   :  { %v629_v35 = vpop.eup %628 }
 0x11f   :  { %395 = vperm.xlu0 %564, %v629_v35  }
 0x17c   :  { %v354_v40 = vpop.permute.xlu1 %353 }
 0x17d   :  { %v351_v45 = vpop.permute.xlu0 %350  ;;  %v407_v51 = vrot.slane %v354_v40, %v406_v43 }
 0x17e   :  { %v402_v52 = vrot.slane %v351_v45, %v401_v44 }
 0x180   :  { %v357_v47 = vpop.permute.xlu1 %356  ;;  %v409_v61 = vsel %vm408_vm2, %v407_v51, %v402_v52 }
 0x181   :  { %v414_v53 = vrot.slane %v357_v47, %v413_v46  ;;  %v504_v47 = vsub.s32 %v501_v39, %v789_v38 }
 0x183   :  { %v416_v1 = vsel %vm415_vm3, %v414_v53, %v409_v61 }
 0x184   :  { %v363_v55 = vpop.permute.xlu1 %362  ;;  %v360_v56 = vpop.permute.xlu0 %359 }
 0x185   :  { %v421_v58 = vrot.slane %v360_v56, %v420_v49  ;;  %v428_v4 = vrot.slane %v363_v55, %v427_v54 }
 0x187   :  { %v423_v6 = vsel %vm422_vm4, %v421_v58, %v416_v1 }
 0x188   :  { %v369_v5 = vpop.permute.xlu1 %368  ;;  %v366_v3 = vpop.permute.xlu0 %365  ;;  %v430_v12 = vsel %vm429_vm5, %v428_v4, %v423_v6 }
 0x189   :  { %v435_v7 = vrot.slane %v366_v3, %v434_v59  ;;  %v442_v11 = vrot.slane %v369_v5, %v441_v62 }
 0x18b   :  { %v437_v15 = vsel %vm436_vm6, %v435_v7, %v430_v12 }
 0x18c   :  { %v375_v0 = vpop.permute.xlu1 %374  ;;  %v372_v13 = vpop.permute.xlu0 %371  ;;  %v444_v20 = vsel %vm443_vm7, %v442_v11, %v437_v15 }
 0x18d   :  { %v449_v16 = vrot.slane %v372_v13, %v448_v8  ;;  %v456_v19 = vrot.slane %v375_v0, %v455_v10 }
 0x18f   :  { %v451_v24 = vsel %vm450_vm8, %v449_v16, %v444_v20 }
 0x190   :  { %v381_v21 = vpop.permute.xlu1 %380  ;;  %v378_v22 = vpop.permute.xlu0 %377  ;;  %v458_v29 = vsel %vm457_vm9, %v456_v19, %v451_v24 }
 0x191   :  { %v463_v25 = vrot.slane %v378_v22, %v462_v17  ;;  %v470_v28 = vrot.slane %v381_v21, %v469_v2 }
 0x193   :  { %v465_v34 = vsel %vm464_vm10, %v463_v25, %v458_v29 }
 0x194   :  { %v387_v31 = vpop.permute.xlu1 %386  ;;  %v384_v32 = vpop.permute.xlu0 %383  ;;  %v472_v41 = vsel %vm471_vm11, %v470_v28, %v465_v34 }
 0x195   :  { %v477_v35 = vrot.slane %v384_v32, %v476_v26  ;;  %v484_v40 = vrot.slane %v387_v31, %v483_v30 }
 0x197   :  { %v479_v43 = vsel %vm478_vm12, %v477_v35, %v472_v41 }
 0x198   :  { %v393_v44 = vpop.permute.xlu1 %392  ;;  %v486_v49 = vsel %vm485_vm13, %v484_v40, %v479_v43 }
 0x199   :  { %v498_v48 = vrot.slane %v393_v44, %v497_v42 }
 0x19a   :  { %v390_v45 = vpop.permute.xlu0 %389 }
 0x19b   :  { %v491_v46 = vrot.slane %v390_v45, %v490_v36 }
 0x19d   :  { %v493_v50 = vsel %vm492_vm14, %v491_v46, %v486_v49 }
 0x19e   :  { %v396_v51 = vpop.permute.xlu0 %395  ;;  %v500_v52 = vsel %vm499_vm15, %v498_v48, %v493_v50 }
 0x19f   :  { %v505_v37 = vrot.slane %v396_v51, %v504_v47 }
 0x1a1   :  { %v507_v53 = vsel %vm506_vm0, %v505_v37, %v500_v52 }
 0x1a2   :  { %509 = vst [vmem:[#allocation8] sm:$0x1] %v507_v53 }
 0x1a3   :  { %673 = shalt.err (!%p670_p2)
}
 0x1a4   :  { %s674_s23 = scalar_lea.hbm %s839_s4, 16 }
 0x1a5   :  { %p675_p3 = scmp.ne.s32.totalorder %s839_s4, %s674_s23  ;;  %p678_p4 = scmp.lt.u32.totalorder %s674_s23, %s839_s4 }
 0x1a7   :  { %p680_p5 = pnand %p678_p4, %p675_p3 }
 0x1a9   :  { %683 = shalt.err (!%p680_p5)
}
 0x1aa   :  { %519 = dma.vmem_to_hbm [thread:$0]  %s517_s18, 16, %s839_s4, [#allocation7]  }
 0x1ab   :  { %692 = dma.done.wait [#allocation7], 16  }
 0x1ac   :  { %693 = vsyncadd [#allocation7], 4294967280 }
 0x1ad   :  { %523 = vsyncpa [#allocation6], 1 }
 0x1ae   :  { %524 = vsyncpa [#allocation7], 1 }

</bundles_post_ra>
